<compile_context>
chip_gen: v7x
topology: tpu7x:2x2x1
jax: 0.10.0
libtpu: 0.0.40
codegen_flags: <defaults>
</compile_context>

<pallas_src>
import math

import jax
import jax.numpy as jnp
from jax import lax
from jax.experimental import pallas as pl
from jax.experimental.pallas import tpu as pltpu


def _make_attn_kernel(sq, sk, b_blk, chunk, scale, out_dtype):
    """Kernel over one batch block (batch on lanes).

    Refs (all lane-dense in batch):
      q_ref: (Sq, Bblk), k_ref: (Sk, Bblk), v_ref: (Sk, Bblk), o_ref: (Sq, Bblk)
    """
    n_full = b_blk // chunk
    rem = b_blk % chunk

    def attn_kernel(q_ref, k_ref, v_ref, o_ref):
        def process(off, width):
            # k / v for this lane-chunk, upcast to f32 for compute.
            k = k_ref[:, pl.ds(off, width)].astype(jnp.float32)   # (Sk, W)
            v = v_ref[:, pl.ds(off, width)].astype(jnp.float32)   # (Sk, W)
            # Hoisted softmax-max helpers: max_j(q*k_j) is exact from these.
            kmax = jnp.max(k, axis=0, keepdims=True)               # (1, W)
            kmin = jnp.min(k, axis=0, keepdims=True)               # (1, W)

            if sq <= 16:
                # Small Sq: static unroll, accumulate rows, single store.
                q = q_ref[:, pl.ds(off, width)].astype(jnp.float32)  # (Sq, W)
                if scale != 1.0:  # dead code for d_k == 1
                    q = q * scale
                rows = []
                for i in range(sq):
                    qi = q[i : i + 1, :]                            # (1, W)
                    m = jnp.where(qi >= 0, qi * kmax, qi * kmin)    # exact row max
                    e = jnp.exp(qi * k - m)                         # (Sk, W)
                    denom = jnp.sum(e, axis=0, keepdims=True)       # (1, W)
                    num = jnp.sum(e * v, axis=0, keepdims=True)     # (1, W)
                    rows.append(num * pl.reciprocal(denom, approx=True))
                out_blk = jnp.concatenate(rows, axis=0)             # (Sq, W)
                o_ref[:, pl.ds(off, width)] = out_blk.astype(o_ref.dtype)
            else:
                # Larger Sq: fori_loop to bound vreg live ranges; per-row store
                # is still a full-lane-width (unmasked-lane) row write.
                def row_body(i, carry):
                    qi = q_ref[pl.ds(i, 1), pl.ds(off, width)].astype(jnp.float32)
                    if scale != 1.0:
                        qi = qi * scale
                    m = jnp.where(qi >= 0, qi * kmax, qi * kmin)
                    e = jnp.exp(qi * k - m)
                    denom = jnp.sum(e, axis=0, keepdims=True)
                    num = jnp.sum(e * v, axis=0, keepdims=True)
                    o_ref[pl.ds(i, 1), pl.ds(off, width)] = (
                        num * pl.reciprocal(denom, approx=True)
                    ).astype(o_ref.dtype)
                    return carry

                lax.fori_loop(0, sq, row_body, 0)

        # Full-width chunks (lane-dense, unmasked), then a static ragged tail.
        if n_full == 1:
            process(0, chunk)
        elif n_full > 1:
            def chunk_body(c, carry):
                off = pl.multiple_of(c * chunk, chunk)
                process(off, chunk)
                return carry

            lax.fori_loop(0, n_full, chunk_body, 0)
        if rem > 0:
            process(n_full * chunk, rem)

    return attn_kernel


def attention_pallas(query, key, value, d_q=1, d_k=1, d_v=1):
    """Mirrors Attention.forward: view -> matmul -> scale -> softmax -> matmul."""
    if not (d_q == 1 and d_k == 1 and d_v == 1):
        # TODO(synk): general d_* > 1 would use an MXU path; module fixes d_* = 1.
        raise NotImplementedError("kernel is specialized for d_q = d_k = d_v = 1")

    sq = query.shape[-2]
    sk = key.shape[-2]
    assert value.shape[-2] == sk, "key/value sequence lengths must match"

    out_dtype = jnp.result_type(query.dtype, key.dtype, value.dtype)
    if not jnp.issubdtype(out_dtype, jnp.floating):
        out_dtype = jnp.float32

    def _prep(x, s):
        x = jnp.asarray(x)
        if not jnp.issubdtype(x.dtype, jnp.floating):
            x = x.astype(jnp.float32)
        # .view(-1, S, 1) with the unit dim squeezed, then batch -> lane axis.
        return jnp.reshape(x, (-1, s)).T  # (S, B)

    q_t = _prep(query, sq)
    k_t = _prep(key, sk)
    v_t = _prep(value, sk)

    B = q_t.shape[1]
    assert k_t.shape[1] == B and v_t.shape[1] == B, "batch mismatch after view"

    CHUNK = 512        # in-kernel lane chunk (multiple of 128)
    BBLK_MAX = 4096    # lanes per grid step; footprint ~1 MiB double-buffered

    if B <= 2 * CHUNK:
        # Single block; block == full dim so no (8,128) divisibility needed.
        b_blk = B
    else:
        # Tile: multiple of CHUNK, capped, and sized so grid >= 2 steps
        # (keeps both v7x TensorCores busy via the "parallel" axis).
        half = -(-B // 2)
        b_blk = min(BBLK_MAX, ((half + CHUNK - 1) // CHUNK) * CHUNK)

    grid = (pl.cdiv(B, b_blk),)  # ragged last block handled by Pallas masking

    scale = 1.0 / math.sqrt(d_k)
    kernel = _make_attn_kernel(sq, sk, b_blk, CHUNK, scale, out_dtype)

    out_t = pl.pallas_call(
        kernel,
        out_shape=jax.ShapeDtypeStruct((sq, B), out_dtype),
        grid_spec=pltpu.PrefetchScalarGridSpec(
            num_scalar_prefetch=0,
            grid=grid,
            in_specs=[
                pl.BlockSpec((sq, b_blk), lambda b: (0, b)),
                pl.BlockSpec((sk, b_blk), lambda b: (0, b)),
                pl.BlockSpec((sk, b_blk), lambda b: (0, b)),
            ],
            out_specs=pl.BlockSpec((sq, b_blk), lambda b: (0, b)),
        ),
        # Footprint (<= ~1 MiB) fits the smallest default scoped VMEM (v5e
        # 16 MiB), so no vmem_limit_bytes override is required on any gen.
        compiler_params=pltpu.CompilerParams(
            dimension_semantics=("parallel",),
        ),
    )(q_t, k_t, v_t)

    # (Sq, B) -> (B, Sq) -> module output shape (B, Sq, d_v).
    return jnp.reshape(out_t.T, (B, sq, d_v))


def attention_ref(query, key, value, d_q=1, d_k=1, d_v=1):
    q = jnp.reshape(query, (-1, query.shape[-2], d_q)).astype(jnp.float32)
    k = jnp.reshape(key, (-1, key.shape[-2], d_k)).astype(jnp.float32)
    v = jnp.reshape(value, (-1, value.shape[-2], d_v)).astype(jnp.float32)
    s = jnp.matmul(q, jnp.swapaxes(k, -2, -1)) * (1.0 / math.sqrt(d_k))
    p = jax.nn.softmax(s, axis=-1)
    return jnp.matmul(p, v)


if __name__ == "__main__":
    # Module constants: d_q = d_k = d_v = 1.
    d_q = d_k = d_v = 1

    key0 = jax.random.PRNGKey(0)
    kq, kk, kv = jax.random.split(key0, 3)

    # Small shapes consistent with forward's .view(-1, shape[-2], 1):
    # leading dims flatten into the batch -> B = 4, Sq = Sk = 8.
    query = jax.random.normal(kq, (2, 2, 8, d_q), dtype=jnp.float32)
    key_t = jax.random.normal(kk, (2, 2, 8, d_k), dtype=jnp.float32)
    value = jax.random.normal(kv, (2, 2, 8, d_v), dtype=jnp.float32)

    out = attention_pallas(query, key_t, value, d_q=d_q, d_k=d_k, d_v=d_v)
    out = jax.block_until_ready(out)

    ref = attention_ref(query, key_t, value, d_q=d_q, d_k=d_k, d_v=d_v)
    assert out.shape == ref.shape, (out.shape, ref.shape)
    # Tolerance allows for the EUP approx-reciprocal softmax normalization.
    assert jnp.allclose(out, ref, atol=2e-3, rtol=2e-3), "mismatch vs reference"

    print("KERNEL_OK")
</pallas_src>

<mosaic_0001>
module attributes {stable_mosaic.version = 11 : i64} {
  func.func @attn_kernel(%arg0: i32, %arg1: memref<8x4xf32, #tpu.memory_space<vmem>>, %arg2: memref<8x4xf32, #tpu.memory_space<vmem>>, %arg3: memref<8x4xf32, #tpu.memory_space<vmem>>, %arg4: memref<8x4xf32, #tpu.memory_space<vmem>>) attributes {dimension_semantics = [#tpu.dimension_semantics<parallel>], iteration_bounds = array<i64: 1>, scalar_prefetch = 0 : i64, scratch_operands = 0 : i64, tpu.core_type = #tpu.core_type<tc>, window_params = [{transform_indices = @transform_0, window_bounds = array<i64: 8, 4>}, {transform_indices = @transform_1, window_bounds = array<i64: 8, 4>}, {transform_indices = @transform_2, window_bounds = array<i64: 8, 4>}, {transform_indices = @transform_3, window_bounds = array<i64: 8, 4>}]} {
    %c0 = arith.constant 0 : index
    %c0_0 = arith.constant 0 : index
    %0 = vector.load %arg2[%c0, %c0_0] : memref<8x4xf32, #tpu.memory_space<vmem>>, vector<8x4xf32>
    %c0_1 = arith.constant 0 : index
    %c0_2 = arith.constant 0 : index
    %1 = vector.load %arg3[%c0_1, %c0_2] : memref<8x4xf32, #tpu.memory_space<vmem>>, vector<8x4xf32>
    %cst = arith.constant dense<0xFF800000> : vector<4xf32>
    %2 = vector.multi_reduction <maximumf>, %0, %cst [0] : vector<8x4xf32> to vector<4xf32>
    %3 = vector.shape_cast %2 : vector<4xf32> to vector<1x4xf32>
    %cst_3 = arith.constant dense<0x7F800000> : vector<4xf32>
    %4 = vector.multi_reduction <minimumf>, %0, %cst_3 [0] : vector<8x4xf32> to vector<4xf32>
    %5 = vector.shape_cast %4 : vector<4xf32> to vector<1x4xf32>
    %c0_4 = arith.constant 0 : index
    %c0_5 = arith.constant 0 : index
    %6 = vector.load %arg1[%c0_4, %c0_5] : memref<8x4xf32, #tpu.memory_space<vmem>>, vector<8x4xf32>
    %7 = vector.extract_strided_slice %6 {offsets = [0, 0], sizes = [1, 4], strides = [1, 1]} : vector<8x4xf32> to vector<1x4xf32>
    %cst_6 = arith.constant 0.000000e+00 : f32
    %8 = vector.broadcast %cst_6 : f32 to vector<1x4xf32>
    %9 = arith.cmpf oge, %7, %8 : vector<1x4xf32>
    %10 = arith.mulf %7, %3 : vector<1x4xf32>
    %11 = arith.mulf %7, %5 : vector<1x4xf32>
    %12 = arith.select %9, %10, %11 : vector<1x4xi1>, vector<1x4xf32>
    %13 = vector.broadcast %7 : vector<1x4xf32> to vector<8x4xf32>
    %14 = arith.mulf %13, %0 : vector<8x4xf32>
    %15 = vector.broadcast %12 : vector<1x4xf32> to vector<8x4xf32>
    %16 = arith.subf %14, %15 : vector<8x4xf32>
    %17 = math.exp %16 : vector<8x4xf32>
    %cst_7 = arith.constant dense<0.000000e+00> : vector<4xf32>
    %18 = vector.multi_reduction <add>, %17, %cst_7 [0] : vector<8x4xf32> to vector<4xf32>
    %19 = vector.shape_cast %18 : vector<4xf32> to vector<1x4xf32>
    %20 = arith.mulf %17, %1 : vector<8x4xf32>
    %cst_8 = arith.constant dense<0.000000e+00> : vector<4xf32>
    %21 = vector.multi_reduction <add>, %20, %cst_8 [0] : vector<8x4xf32> to vector<4xf32>
    %22 = vector.shape_cast %21 : vector<4xf32> to vector<1x4xf32>
    %23 = tpu.reciprocal %19 {approx = true} : vector<1x4xf32> -> vector<1x4xf32>
    %24 = arith.mulf %22, %23 : vector<1x4xf32>
    %25 = vector.extract_strided_slice %6 {offsets = [1, 0], sizes = [1, 4], strides = [1, 1]} : vector<8x4xf32> to vector<1x4xf32>
    %cst_9 = arith.constant 0.000000e+00 : f32
    %26 = vector.broadcast %cst_9 : f32 to vector<1x4xf32>
    %27 = arith.cmpf oge, %25, %26 : vector<1x4xf32>
    %28 = arith.mulf %25, %3 : vector<1x4xf32>
    %29 = arith.mulf %25, %5 : vector<1x4xf32>
    %30 = arith.select %27, %28, %29 : vector<1x4xi1>, vector<1x4xf32>
    %31 = vector.broadcast %25 : vector<1x4xf32> to vector<8x4xf32>
    %32 = arith.mulf %31, %0 : vector<8x4xf32>
    %33 = vector.broadcast %30 : vector<1x4xf32> to vector<8x4xf32>
    %34 = arith.subf %32, %33 : vector<8x4xf32>
    %35 = math.exp %34 : vector<8x4xf32>
    %cst_10 = arith.constant dense<0.000000e+00> : vector<4xf32>
    %36 = vector.multi_reduction <add>, %35, %cst_10 [0] : vector<8x4xf32> to vector<4xf32>
    %37 = vector.shape_cast %36 : vector<4xf32> to vector<1x4xf32>
    %38 = arith.mulf %35, %1 : vector<8x4xf32>
    %cst_11 = arith.constant dense<0.000000e+00> : vector<4xf32>
    %39 = vector.multi_reduction <add>, %38, %cst_11 [0] : vector<8x4xf32> to vector<4xf32>
    %40 = vector.shape_cast %39 : vector<4xf32> to vector<1x4xf32>
    %41 = tpu.reciprocal %37 {approx = true} : vector<1x4xf32> -> vector<1x4xf32>
    %42 = arith.mulf %40, %41 : vector<1x4xf32>
    %43 = vector.extract_strided_slice %6 {offsets = [2, 0], sizes = [1, 4], strides = [1, 1]} : vector<8x4xf32> to vector<1x4xf32>
    %cst_12 = arith.constant 0.000000e+00 : f32
    %44 = vector.broadcast %cst_12 : f32 to vector<1x4xf32>
    %45 = arith.cmpf oge, %43, %44 : vector<1x4xf32>
    %46 = arith.mulf %43, %3 : vector<1x4xf32>
    %47 = arith.mulf %43, %5 : vector<1x4xf32>
    %48 = arith.select %45, %46, %47 : vector<1x4xi1>, vector<1x4xf32>
    %49 = vector.broadcast %43 : vector<1x4xf32> to vector<8x4xf32>
    %50 = arith.mulf %49, %0 : vector<8x4xf32>
    %51 = vector.broadcast %48 : vector<1x4xf32> to vector<8x4xf32>
    %52 = arith.subf %50, %51 : vector<8x4xf32>
    %53 = math.exp %52 : vector<8x4xf32>
    %cst_13 = arith.constant dense<0.000000e+00> : vector<4xf32>
    %54 = vector.multi_reduction <add>, %53, %cst_13 [0] : vector<8x4xf32> to vector<4xf32>
    %55 = vector.shape_cast %54 : vector<4xf32> to vector<1x4xf32>
    %56 = arith.mulf %53, %1 : vector<8x4xf32>
    %cst_14 = arith.constant dense<0.000000e+00> : vector<4xf32>
    %57 = vector.multi_reduction <add>, %56, %cst_14 [0] : vector<8x4xf32> to vector<4xf32>
    %58 = vector.shape_cast %57 : vector<4xf32> to vector<1x4xf32>
    %59 = tpu.reciprocal %55 {approx = true} : vector<1x4xf32> -> vector<1x4xf32>
    %60 = arith.mulf %58, %59 : vector<1x4xf32>
    %61 = vector.extract_strided_slice %6 {offsets = [3, 0], sizes = [1, 4], strides = [1, 1]} : vector<8x4xf32> to vector<1x4xf32>
    %cst_15 = arith.constant 0.000000e+00 : f32
    %62 = vector.broadcast %cst_15 : f32 to vector<1x4xf32>
    %63 = arith.cmpf oge, %61, %62 : vector<1x4xf32>
    %64 = arith.mulf %61, %3 : vector<1x4xf32>
    %65 = arith.mulf %61, %5 : vector<1x4xf32>
    %66 = arith.select %63, %64, %65 : vector<1x4xi1>, vector<1x4xf32>
    %67 = vector.broadcast %61 : vector<1x4xf32> to vector<8x4xf32>
    %68 = arith.mulf %67, %0 : vector<8x4xf32>
    %69 = vector.broadcast %66 : vector<1x4xf32> to vector<8x4xf32>
    %70 = arith.subf %68, %69 : vector<8x4xf32>
    %71 = math.exp %70 : vector<8x4xf32>
    %cst_16 = arith.constant dense<0.000000e+00> : vector<4xf32>
    %72 = vector.multi_reduction <add>, %71, %cst_16 [0] : vector<8x4xf32> to vector<4xf32>
    %73 = vector.shape_cast %72 : vector<4xf32> to vector<1x4xf32>
    %74 = arith.mulf %71, %1 : vector<8x4xf32>
    %cst_17 = arith.constant dense<0.000000e+00> : vector<4xf32>
    %75 = vector.multi_reduction <add>, %74, %cst_17 [0] : vector<8x4xf32> to vector<4xf32>
    %76 = vector.shape_cast %75 : vector<4xf32> to vector<1x4xf32>
    %77 = tpu.reciprocal %73 {approx = true} : vector<1x4xf32> -> vector<1x4xf32>
    %78 = arith.mulf %76, %77 : vector<1x4xf32>
    %79 = vector.extract_strided_slice %6 {offsets = [4, 0], sizes = [1, 4], strides = [1, 1]} : vector<8x4xf32> to vector<1x4xf32>
    %cst_18 = arith.constant 0.000000e+00 : f32
    %80 = vector.broadcast %cst_18 : f32 to vector<1x4xf32>
    %81 = arith.cmpf oge, %79, %80 : vector<1x4xf32>
    %82 = arith.mulf %79, %3 : vector<1x4xf32>
    %83 = arith.mulf %79, %5 : vector<1x4xf32>
    %84 = arith.select %81, %82, %83 : vector<1x4xi1>, vector<1x4xf32>
    %85 = vector.broadcast %79 : vector<1x4xf32> to vector<8x4xf32>
    %86 = arith.mulf %85, %0 : vector<8x4xf32>
    %87 = vector.broadcast %84 : vector<1x4xf32> to vector<8x4xf32>
    %88 = arith.subf %86, %87 : vector<8x4xf32>
    %89 = math.exp %88 : vector<8x4xf32>
    %cst_19 = arith.constant dense<0.000000e+00> : vector<4xf32>
    %90 = vector.multi_reduction <add>, %89, %cst_19 [0] : vector<8x4xf32> to vector<4xf32>
    %91 = vector.shape_cast %90 : vector<4xf32> to vector<1x4xf32>
    %92 = arith.mulf %89, %1 : vector<8x4xf32>
    %cst_20 = arith.constant dense<0.000000e+00> : vector<4xf32>
    %93 = vector.multi_reduction <add>, %92, %cst_20 [0] : vector<8x4xf32> to vector<4xf32>
    %94 = vector.shape_cast %93 : vector<4xf32> to vector<1x4xf32>
    %95 = tpu.reciprocal %91 {approx = true} : vector<1x4xf32> -> vector<1x4xf32>
    %96 = arith.mulf %94, %95 : vector<1x4xf32>
    %97 = vector.extract_strided_slice %6 {offsets = [5, 0], sizes = [1, 4], strides = [1, 1]} : vector<8x4xf32> to vector<1x4xf32>
    %cst_21 = arith.constant 0.000000e+00 : f32
    %98 = vector.broadcast %cst_21 : f32 to vector<1x4xf32>
    %99 = arith.cmpf oge, %97, %98 : vector<1x4xf32>
    %100 = arith.mulf %97, %3 : vector<1x4xf32>
    %101 = arith.mulf %97, %5 : vector<1x4xf32>
    %102 = arith.select %99, %100, %101 : vector<1x4xi1>, vector<1x4xf32>
    %103 = vector.broadcast %97 : vector<1x4xf32> to vector<8x4xf32>
    %104 = arith.mulf %103, %0 : vector<8x4xf32>
    %105 = vector.broadcast %102 : vector<1x4xf32> to vector<8x4xf32>
    %106 = arith.subf %104, %105 : vector<8x4xf32>
    %107 = math.exp %106 : vector<8x4xf32>
    %cst_22 = arith.constant dense<0.000000e+00> : vector<4xf32>
    %108 = vector.multi_reduction <add>, %107, %cst_22 [0] : vector<8x4xf32> to vector<4xf32>
    %109 = vector.shape_cast %108 : vector<4xf32> to vector<1x4xf32>
    %110 = arith.mulf %107, %1 : vector<8x4xf32>
    %cst_23 = arith.constant dense<0.000000e+00> : vector<4xf32>
    %111 = vector.multi_reduction <add>, %110, %cst_23 [0] : vector<8x4xf32> to vector<4xf32>
    %112 = vector.shape_cast %111 : vector<4xf32> to vector<1x4xf32>
    %113 = tpu.reciprocal %109 {approx = true} : vector<1x4xf32> -> vector<1x4xf32>
    %114 = arith.mulf %112, %113 : vector<1x4xf32>
    %115 = vector.extract_strided_slice %6 {offsets = [6, 0], sizes = [1, 4], strides = [1, 1]} : vector<8x4xf32> to vector<1x4xf32>
    %cst_24 = arith.constant 0.000000e+00 : f32
    %116 = vector.broadcast %cst_24 : f32 to vector<1x4xf32>
    %117 = arith.cmpf oge, %115, %116 : vector<1x4xf32>
    %118 = arith.mulf %115, %3 : vector<1x4xf32>
    %119 = arith.mulf %115, %5 : vector<1x4xf32>
    %120 = arith.select %117, %118, %119 : vector<1x4xi1>, vector<1x4xf32>
    %121 = vector.broadcast %115 : vector<1x4xf32> to vector<8x4xf32>
    %122 = arith.mulf %121, %0 : vector<8x4xf32>
    %123 = vector.broadcast %120 : vector<1x4xf32> to vector<8x4xf32>
    %124 = arith.subf %122, %123 : vector<8x4xf32>
    %125 = math.exp %124 : vector<8x4xf32>
    %cst_25 = arith.constant dense<0.000000e+00> : vector<4xf32>
    %126 = vector.multi_reduction <add>, %125, %cst_25 [0] : vector<8x4xf32> to vector<4xf32>
    %127 = vector.shape_cast %126 : vector<4xf32> to vector<1x4xf32>
    %128 = arith.mulf %125, %1 : vector<8x4xf32>
    %cst_26 = arith.constant dense<0.000000e+00> : vector<4xf32>
    %129 = vector.multi_reduction <add>, %128, %cst_26 [0] : vector<8x4xf32> to vector<4xf32>
    %130 = vector.shape_cast %129 : vector<4xf32> to vector<1x4xf32>
    %131 = tpu.reciprocal %127 {approx = true} : vector<1x4xf32> -> vector<1x4xf32>
    %132 = arith.mulf %130, %131 : vector<1x4xf32>
    %133 = vector.extract_strided_slice %6 {offsets = [7, 0], sizes = [1, 4], strides = [1, 1]} : vector<8x4xf32> to vector<1x4xf32>
    %cst_27 = arith.constant 0.000000e+00 : f32
    %134 = vector.broadcast %cst_27 : f32 to vector<1x4xf32>
    %135 = arith.cmpf oge, %133, %134 : vector<1x4xf32>
    %136 = arith.mulf %133, %3 : vector<1x4xf32>
    %137 = arith.mulf %133, %5 : vector<1x4xf32>
    %138 = arith.select %135, %136, %137 : vector<1x4xi1>, vector<1x4xf32>
    %139 = vector.broadcast %133 : vector<1x4xf32> to vector<8x4xf32>
    %140 = arith.mulf %139, %0 : vector<8x4xf32>
    %141 = vector.broadcast %138 : vector<1x4xf32> to vector<8x4xf32>
    %142 = arith.subf %140, %141 : vector<8x4xf32>
    %143 = math.exp %142 : vector<8x4xf32>
    %cst_28 = arith.constant dense<0.000000e+00> : vector<4xf32>
    %144 = vector.multi_reduction <add>, %143, %cst_28 [0] : vector<8x4xf32> to vector<4xf32>
    %145 = vector.shape_cast %144 : vector<4xf32> to vector<1x4xf32>
    %146 = arith.mulf %143, %1 : vector<8x4xf32>
    %cst_29 = arith.constant dense<0.000000e+00> : vector<4xf32>
    %147 = vector.multi_reduction <add>, %146, %cst_29 [0] : vector<8x4xf32> to vector<4xf32>
    %148 = vector.shape_cast %147 : vector<4xf32> to vector<1x4xf32>
    %149 = tpu.reciprocal %145 {approx = true} : vector<1x4xf32> -> vector<1x4xf32>
    %150 = arith.mulf %148, %149 : vector<1x4xf32>
    %151 = tpu.concatenate %24, %42, %60, %78, %96, %114, %132, %150 in 0 : vector<1x4xf32>, vector<1x4xf32>, vector<1x4xf32>, vector<1x4xf32>, vector<1x4xf32>, vector<1x4xf32>, vector<1x4xf32>, vector<1x4xf32> -> vector<8x4xf32>
    %c0_30 = arith.constant 0 : index
    %c0_31 = arith.constant 0 : index
    %152 = vector.load %arg4[%c0_30, %c0_31] : memref<8x4xf32, #tpu.memory_space<vmem>>, vector<8x4xf32>
    tpu.vector_store %arg4[%c0_30, %c0_31], %151 {strides = array<i32>} : memref<8x4xf32, #tpu.memory_space<vmem>>, vector<8x4xf32>,
    return
  }
  func.func @transform_0(%arg0: i32) -> (i32, i32) {
    %c0_i32 = arith.constant 0 : i32
    %c0_i32_0 = arith.constant 0 : i32
    return %c0_i32, %arg0 : i32, i32
  }
  func.func @transform_1(%arg0: i32) -> (i32, i32) {
    %c0_i32 = arith.constant 0 : i32
    %c0_i32_0 = arith.constant 0 : i32
    return %c0_i32, %arg0 : i32, i32
  }
  func.func @transform_2(%arg0: i32) -> (i32, i32) {
    %c0_i32 = arith.constant 0 : i32
    %c0_i32_0 = arith.constant 0 : i32
    return %c0_i32, %arg0 : i32, i32
  }
  func.func @transform_3(%arg0: i32) -> (i32, i32) {
    %c0_i32 = arith.constant 0 : i32
    %c0_i32_0 = arith.constant 0 : i32
    return %c0_i32, %arg0 : i32, i32
  }
}

</mosaic_0001>

<bundles_post_ra>
// kernel: tpu_custom_call.1
= control target key start
LH: loop header
LB: loop body
LE: loop exit
PB: predicated region body
PF: predicated region fallthrough
CT: control target
= control target key end

     0   :  { %vm16_vm0 = vcmask 31744   ;;  %v36_v0 = vlaneseq  ;;  %vm268_vm2 = vcmask 1040384   ;;  %vm270_vm3 = vcmask 1041408   ;;  %s380_s1 = inlined_call_operand.vmem [shape: f32[8,4], index: 1, kind: input, shape index: {}]   ;;  %s381_s0 = inlined_call_operand.vmem [shape: f32[8,4], index: 0, kind: input, shape index: {}]   ;;  %s382_s2 = inlined_call_operand.vmem [shape: f32[8,4], index: 2, kind: input, shape index: {}]   ;;  %s383_s3 = inlined_call_operand.vmem [shape: f32[8,4], index: 3, kind: output, shape index: {}]  }
   0x1   :  { %v14_v1 = vld [vmem:[%s380_s1] sm:$0xff]  ;;  %vm272_vm4 = vcmask 1042432   ;;  %vm274_vm5 = vcmask 1043456   ;;  %vm276_vm6 = vcmask 1044480   ;;  %vm278_vm7 = vcmask 1045504  }
   0x2   :  { %v17_v2 = vsel %vm16_vm0, %v14_v1, -inf  ;;  %v24_v3 = vsel %vm16_vm0, %v14_v1, inf  ;;  %v37_v6 = vshrl.u32 %v36_v0, 7  ;;  %v31_v17 = vld [vmem:[%s381_s0] sm:$0xff]  ;;  %vm280_vm8 = vcmask 1046528  }
   0x3   :  { %v18_v4 = vrot.slane %v17_v2, 4  ;;  %v25_v5 = vrot.slane %v24_v3, 4  ;;  %vm32_vm1 = vcmp.ge.f32.partialorder %v31_v17, 0.0 }
   0x4   :  { %v38_v11 = vsub.s32 0, %v37_v6  ;;  %v67_v12 = vsub.s32 1, %v37_v6  ;;  %v96_v13 = vsub.s32 2, %v37_v6  ;;  %v125_v14 = vsub.s32 3, %v37_v6 }
   0x5   :  { %v19_v7 = vmax.f32 %v17_v2, %v18_v4  ;;  %v26_v8 = vmin.f32 %v24_v3, %v25_v5  ;;  %v154_v26 = vsub.s32 4, %v37_v6  ;;  %v183_v27 = vsub.s32 5, %v37_v6  ;;  %v350_v5 = vld [vmem:[%s382_s2] sm:$0xff] }
   0x6   :  { %v39_v20 = vrot.slane %v31_v17, %v38_v11  ;;  %v68_v21 = vrot.slane %v31_v17, %v67_v12  ;;  %v97_v22 = vrot.slane %v31_v17, %v96_v13  ;;  %v126_v23 = vrot.slane %v31_v17, %v125_v14 }
   0x7   :  { %v20_v9 = vrot.slane %v19_v7, 2  ;;  %v27_v10 = vrot.slane %v26_v8, 2  ;;  %v212_v30 = vsub.s32 6, %v37_v6  ;;  %v241_v31 = vsub.s32 7, %v37_v6 }
   0x8   :  { %v40_v32 = vmul.f32 %v39_v20, %v14_v1  ;;  %v69_v33 = vmul.f32 %v68_v21, %v14_v1  ;;  %v98_v34 = vmul.f32 %v97_v22, %v14_v1  ;;  %v127_v35 = vmul.f32 %v126_v23, %v14_v1 }
   0x9   :  { %v21_v15 = vmax.f32 %v19_v7, %v20_v9  ;;  %v28_v16 = vmin.f32 %v26_v8, %v27_v10  ;;  %v155_v37 = vrot.slane %v31_v17, %v154_v26  ;;  %v184_v38 = vrot.slane %v31_v17, %v183_v27 }
   0xa   :  { %v213_v43 = vrot.slane %v31_v17, %v212_v30  ;;  %v242_v44 = vrot.slane %v31_v17, %v241_v31 }
   0xb   :  { %v22_v18 = vrot.slane %v21_v15, 1  ;;  %v29_v19 = vrot.slane %v28_v16, 1  ;;  %v156_v49 = vmul.f32 %v155_v37, %v14_v1  ;;  %v185_v51 = vmul.f32 %v184_v38, %v14_v1 }
   0xc   :  { %v214_v57 = vmul.f32 %v213_v43, %v14_v1  ;;  %v243_v59 = vmul.f32 %v242_v44, %v14_v1 }
   0xd   :  { %v23_v24 = vmax.f32 %v21_v15, %v22_v18  ;;  %v30_v25 = vmin.f32 %v28_v16, %v29_v19 }
   0xf   :  { %v33_v28 = vmul.f32 %v31_v17, %v23_v24  ;;  %v34_v29 = vmul.f32 %v31_v17, %v30_v25 }
  0x11   :  { %v35_v36 = vsel %vm32_vm1, %v33_v28, %v34_v29 }
  0x12   :  { %v44_v39 = vrot.slane %v35_v36, %v38_v11  ;;  %v73_v40 = vrot.slane %v35_v36, %v67_v12  ;;  %v102_v41 = vrot.slane %v35_v36, %v96_v13  ;;  %v131_v42 = vrot.slane %v35_v36, %v125_v14 }
  0x13   :  { %v160_v50 = vrot.slane %v35_v36, %v154_v26  ;;  %v189_v55 = vrot.slane %v35_v36, %v183_v27  ;;  %v218_v58 = vrot.slane %v35_v36, %v212_v30  ;;  %v247_v60 = vrot.slane %v35_v36, %v241_v31 }
  0x14   :  { %v45_v45 = vsub.f32 %v40_v32, %v44_v39  ;;  %v74_v46 = vsub.f32 %v69_v33, %v73_v40  ;;  %v103_v47 = vsub.f32 %v98_v34, %v102_v41  ;;  %v132_v48 = vsub.f32 %v127_v35, %v131_v42 }
  0x15   :  { %v161_v61 = vsub.f32 %v156_v49, %v160_v50  ;;  %v190_v62 = vsub.f32 %v185_v51, %v189_v55  ;;  %v219_v63 = vsub.f32 %v214_v57, %v218_v58  ;;  %v248_v0 = vsub.f32 %v243_v59, %v247_v60 }
  0x16   :  { %v46_v52 = vmul.f32 1.442695, %v45_v45  ;;  %v75_v53 = vmul.f32 1.442695, %v74_v46  ;;  %v104_v54 = vmul.f32 1.442695, %v103_v47 }
  0x17   :  { %v133_v56 = vmul.f32 1.442695, %v132_v48  ;;  %v162_v2 = vmul.f32 1.442695, %v161_v61  ;;  %v191_v3 = vmul.f32 1.442695, %v190_v62 }
  0x18   :  { %287 = vpow2.f32 %v46_v52  ;;  %v220_v4 = vmul.f32 1.442695, %v219_v63  ;;  %v249_v6 = vmul.f32 1.442695, %v248_v0 }
  0x19   :  { %289 = vpow2.f32 %v75_v53 }
  0x1a   :  { %291 = vpow2.f32 %v104_v54 }
  0x1b   :  { %293 = vpow2.f32 %v133_v56 }
  0x1c   :  { %295 = vpow2.f32 %v162_v2 }
  0x1d   :  { %297 = vpow2.f32 %v191_v3 }
  0x1e   :  { %299 = vpow2.f32 %v220_v4 }
  0x1f   :  { %301 = vpow2.f32 %v249_v6 }
  0x22   :  { %v288_v7 = vpop.eup %287 }
  0x23   :  { %v290_v1 = vpop.eup %289  ;;  %v48_v8 = vsel %vm16_vm0, %v288_v7, 0.0  ;;  %v55_v9 = vmul.f32 %v288_v7, %v350_v5 }
  0x24   :  { %v292_v10 = vpop.eup %291  ;;  %v49_v11 = vrot.slane %v48_v8, 4  ;;  %v77_v12 = vsel %vm16_vm0, %v290_v1, 0.0  ;;  %v84_v13 = vmul.f32 %v290_v1, %v350_v5 }
  0x25   :  { %v294_v14 = vpop.eup %293  ;;  %v56_v15 = vsel %vm16_vm0, %v55_v9, 0.0  ;;  %v78_v16 = vrot.slane %v77_v12, 4  ;;  %v106_v17 = vsel %vm16_vm0, %v292_v10, 0.0  ;;  %v113_v18 = vmul.f32 %v292_v10, %v350_v5 }
  0x26   :  { %v50_v19 = vadd.f32 %v49_v11, %v48_v8  ;;  %v57_v20 = vrot.slane %v56_v15, 4  ;;  %v85_v21 = vsel %vm16_vm0, %v84_v13, 0.0  ;;  %v107_v22 = vrot.slane %v106_v17, 4  ;;  %v296_v39 = vpop.eup %295 }
  0x27   :  { %v79_v23 = vadd.f32 %v78_v16, %v77_v12  ;;  %v86_v24 = vrot.slane %v85_v21, 4  ;;  %v114_v25 = vsel %vm16_vm0, %v113_v18, 0.0  ;;  %v135_v26 = vsel %vm16_vm0, %v294_v14, 0.0  ;;  %v298_v44 = vpop.eup %297 }
  0x28   :  { %v51_v27 = vrot.slane %v50_v19, 2  ;;  %v58_v28 = vadd.f32 %v57_v20, %v56_v15  ;;  %v108_v29 = vadd.f32 %v107_v22, %v106_v17  ;;  %v115_v30 = vrot.slane %v114_v25, 4  ;;  %v300_v49 = vpop.eup %299 }
  0x29   :  { %v80_v31 = vrot.slane %v79_v23, 2  ;;  %v87_v32 = vadd.f32 %v86_v24, %v85_v21  ;;  %v136_v33 = vrot.slane %v135_v26, 4  ;;  %v142_v34 = vmul.f32 %v294_v14, %v350_v5  ;;  %v302_v54 = vpop.eup %301 }
  0x2a   :  { %v52_v35 = vadd.f32 %v51_v27, %v50_v19  ;;  %v59_v36 = vrot.slane %v58_v28, 2  ;;  %v109_v37 = vrot.slane %v108_v29, 2  ;;  %v116_v38 = vadd.f32 %v115_v30, %v114_v25 }
  0x2b   :  { %v81_v40 = vadd.f32 %v80_v31, %v79_v23  ;;  %v88_v41 = vrot.slane %v87_v32, 2  ;;  %v137_v42 = vadd.f32 %v136_v33, %v135_v26  ;;  %v143_v43 = vsel %vm16_vm0, %v142_v34, 0.0 }
  0x2c   :  { %v53_v45 = vrot.slane %v52_v35, 1  ;;  %v60_v46 = vadd.f32 %v59_v36, %v58_v28  ;;  %v110_v47 = vadd.f32 %v109_v37, %v108_v29  ;;  %v117_v48 = vrot.slane %v116_v38, 2 }
  0x2d   :  { %v82_v50 = vrot.slane %v81_v40, 1  ;;  %v89_v51 = vadd.f32 %v88_v41, %v87_v32  ;;  %v138_v52 = vrot.slane %v137_v42, 2  ;;  %v144_v53 = vrot.slane %v143_v43, 4 }
  0x2e   :  { %v54_v55 = vadd.f32 %v53_v45, %v52_v35  ;;  %v111_v56 = vrot.slane %v110_v47, 1  ;;  %v118_v57 = vadd.f32 %v117_v48, %v116_v38  ;;  %v61_v61 = vrot.slane %v60_v46, 1 }
  0x2f   :  { %v83_v58 = vadd.f32 %v82_v50, %v81_v40  ;;  %v139_v59 = vadd.f32 %v138_v52, %v137_v42  ;;  %v145_v60 = vadd.f32 %v144_v53, %v143_v43  ;;  %v90_v62 = vrot.slane %v89_v51, 1 }
  0x30   :  { %v112_v63 = vadd.f32 %v111_v56, %v110_v47  ;;  %303 = vrcp.f32 %v54_v55  ;;  %v119_v2 = vrot.slane %v118_v57, 1  ;;  %v164_v3 = vsel %vm16_vm0, %v296_v39, 0.0 }
  0x31   :  { %v140_v0 = vrot.slane %v139_v59, 1  ;;  %v171_v4 = vmul.f32 %v296_v39, %v350_v5  ;;  %305 = vrcp.f32 %v83_v58  ;;  %v146_v6 = vrot.slane %v145_v60, 2 }
  0x32   :  { %v165_v7 = vrot.slane %v164_v3, 4  ;;  %v193_v1 = vsel %vm16_vm0, %v298_v44, 0.0  ;;  %v200_v10 = vmul.f32 %v298_v44, %v350_v5  ;;  %v222_v11 = vsel %vm16_vm0, %v300_v49, 0.0 }
  0x33   :  { %v172_v8 = vsel %vm16_vm0, %v171_v4, 0.0  ;;  %v194_v9 = vrot.slane %v193_v1, 4  ;;  %307 = vrcp.f32 %v112_v63  ;;  %v141_v12 = vadd.f32 %v140_v0, %v139_v59 }
  0x34   :  { %v166_v13 = vadd.f32 %v165_v7, %v164_v3  ;;  %v173_v14 = vrot.slane %v172_v8, 4  ;;  %v201_v16 = vsel %vm16_vm0, %v200_v10, 0.0  ;;  %v223_v17 = vrot.slane %v222_v11, 4 }
  0x35   :  { %v195_v15 = vadd.f32 %v194_v9, %v193_v1  ;;  %v229_v18 = vmul.f32 %v300_v49, %v350_v5  ;;  %v147_v19 = vadd.f32 %v146_v6, %v145_v60  ;;  %v202_v22 = vrot.slane %v201_v16, 4 }
  0x36   :  { %v167_v20 = vrot.slane %v166_v13, 2  ;;  %v174_v21 = vadd.f32 %v173_v14, %v172_v8  ;;  %v224_v24 = vadd.f32 %v223_v17, %v222_v11  ;;  %v251_v26 = vsel %vm16_vm0, %v302_v54, 0.0 }
  0x37   :  { %v196_v23 = vrot.slane %v195_v15, 2  ;;  %v230_v25 = vsel %vm16_vm0, %v229_v18, 0.0  ;;  %309 = vrcp.f32 %v141_v12  ;;  %v203_v28 = vadd.f32 %v202_v22, %v201_v16 }
  0x38   :  { %v168_v27 = vadd.f32 %v167_v20, %v166_v13  ;;  %v231_v29 = vrot.slane %v230_v25, 4  ;;  %v175_v30 = vrot.slane %v174_v21, 2  ;;  %v225_v32 = vrot.slane %v224_v24, 2 }
  0x39   :  { %v197_v31 = vadd.f32 %v196_v23, %v195_v15  ;;  %v252_v33 = vrot.slane %v251_v26, 4  ;;  %v62_v34 = vadd.f32 %v61_v61, %v60_v46  ;;  %v91_v35 = vadd.f32 %v90_v62, %v89_v51 }
  0x3a   :  { %v169_v36 = vrot.slane %v168_v27, 1  ;;  %v258_v37 = vmul.f32 %v302_v54, %v350_v5  ;;  %v304_v38 = vpop.eup %303  ;;  %v204_v40 = vrot.slane %v203_v28, 2  ;;  %v226_v41 = vadd.f32 %v225_v32, %v224_v24 }
  0x3b   :  { %v198_v39 = vrot.slane %v197_v31, 1  ;;  %v232_v42 = vadd.f32 %v231_v29, %v230_v25  ;;  %v306_v43 = vpop.eup %305  ;;  %v120_v44 = vadd.f32 %v119_v2, %v118_v57  ;;  %v148_v45 = vrot.slane %v147_v19, 1 }
  0x3c   :  { %v170_v47 = vadd.f32 %v169_v36, %v168_v27  ;;  %v176_v48 = vadd.f32 %v175_v30, %v174_v21  ;;  %v227_v50 = vrot.slane %v226_v41, 1  ;;  %v253_v52 = vadd.f32 %v252_v33, %v251_v26 }
  0x3d   :  { %v199_v49 = vadd.f32 %v198_v39, %v197_v31  ;;  %v308_v53 = vpop.eup %307  ;;  %v64_v55 = vmul.f32 %v304_v38, %v62_v34  ;;  %v233_v46 = vrot.slane %v232_v42, 2  ;;  %v259_v51 = vsel %vm16_vm0, %v258_v37, 0.0 }
  0x3e   :  { %311 = vrcp.f32 %v170_v47  ;;  %v93_v5 = vmul.f32 %v306_v43, %v91_v35  ;;  %v205_v54 = vadd.f32 %v204_v40, %v203_v28  ;;  %v228_v56 = vadd.f32 %v227_v50, %v226_v41 }
  0x3f   :  { %313 = vrcp.f32 %v199_v49  ;;  %v254_v58 = vrot.slane %v253_v52, 2  ;;  %v260_v59 = vrot.slane %v259_v51, 4  ;;  %v149_v57 = vadd.f32 %v148_v45, %v147_v19 }
  0x40   :  { %v177_v60 = vrot.slane %v176_v48, 1  ;;  %315 = vrcp.f32 %v228_v56  ;;  %v122_v62 = vmul.f32 %v308_v53, %v120_v44  ;;  %v234_v63 = vadd.f32 %v233_v46, %v232_v42 }
  0x41   :  { %v310_v61 = vpop.eup %309  ;;  %v255_v0 = vadd.f32 %v254_v58, %v253_v52  ;;  %v261_v2 = vadd.f32 %v260_v59, %v259_v51  ;;  %v206_v3 = vrot.slane %v205_v54, 1  ;;  %v269_v4 = vsel %vm268_vm2, %v64_v55, %v93_v5 }
  0x42   :  { %v151_v1 = vmul.f32 %v310_v61, %v149_v57  ;;  %v178_v8 = vadd.f32 %v177_v60, %v176_v48  ;;  %v235_v9 = vrot.slane %v234_v63, 1  ;;  %v271_v11 = vsel %vm270_vm3, %v269_v4, %v122_v62 }
  0x43   :  { %v256_v6 = vrot.slane %v255_v0, 1  ;;  %v262_v7 = vrot.slane %v261_v2, 2  ;;  %v207_v12 = vadd.f32 %v206_v3, %v205_v54 }
  0x44   :  { %v273_v17 = vsel %vm272_vm4, %v271_v11, %v151_v1  ;;  %v236_v18 = vadd.f32 %v235_v9, %v234_v63 }
  0x45   :  { %v257_v10 = vadd.f32 %v256_v6, %v255_v0  ;;  %v263_v13 = vadd.f32 %v262_v7, %v261_v2 }
  0x47   :  { %317 = vrcp.f32 %v257_v10  ;;  %v264_v21 = vrot.slane %v263_v13, 1 }
  0x48   :  { %v312_v14 = vpop.eup %311 }
  0x49   :  { %v314_v15 = vpop.eup %313  ;;  %v180_v16 = vmul.f32 %v312_v14, %v178_v8  ;;  %v265_v24 = vadd.f32 %v264_v21, %v263_v13 }
  0x4a   :  { %v316_v19 = vpop.eup %315  ;;  %v209_v20 = vmul.f32 %v314_v15, %v207_v12 }
  0x4b   :  { %v275_v22 = vsel %vm274_vm5, %v273_v17, %v180_v16  ;;  %v238_v23 = vmul.f32 %v316_v19, %v236_v18 }
  0x4c   :  { %v277_v25 = vsel %vm276_vm6, %v275_v22, %v209_v20 }
  0x4d   :  { %v279_v27 = vsel %vm278_vm7, %v277_v25, %v238_v23 }
  0x51   :  { %v318_v26 = vpop.eup %317 }
  0x52   :  { %v267_v28 = vmul.f32 %v318_v26, %v265_v24 }
  0x54   :  { %v281_v29 = vsel %vm280_vm8, %v279_v27, %v267_v28 }
  0x55   :  { %282 = vst.msk [vmem:[%s383_s3] sm:$0xff] %vm16_vm0, %v281_v29 }

</bundles_post_ra>
